<compile_context>
chip_gen: v7x
topology: tpu7x:2x2x1
jax: 0.10.0
libtpu: 0.0.40
codegen_flags: <defaults>
</compile_context>

<pallas_src>
import jax
import jax.numpy as jnp
from jax.experimental import pallas as pl
from jax.experimental.pallas import tpu as pltpu

LANE = 128


def _round_up(x, m):
    return (x + m - 1) // m * m


def _vmem_budget_bytes():
    """Generation-aware scoped-VMEM budget (v7x: 64 MiB/TC; v5e/v6e: 128 MiB)."""
    phys = 64 * 1024 * 1024                       # conservative default (v7x)
    try:
        phys = int(pltpu.get_tpu_info().vmem_capacity_bytes)
    except Exception:                             # query unavailable -> default
        pass
    return max(32 * 1024 * 1024, min(phys // 2, 96 * 1024 * 1024))


def _select_tiles(M, K_pad, C_pad, tile_m, vmem_budget):
    """Pick (TM, TC) so both passes (double-buffered) fit the VMEM budget."""
    TC = 256 if C_pad % 256 == 0 else 128         # native MXU width on v6e/v7x
    TM = _round_up(min(tile_m, _round_up(M, 8)), 8)

    def est(tm):
        pass1 = (2 * tm * K_pad * 2               # patches double-buffer (bf16)
                 + 2 * K_pad * TC * 2             # weight tile double-buffer
                 + 2 * tm * TC * 2                # y output double-buffer (bf16)
                 + tm * TC * 4                    # f32 matmul result temp
                 + 4 * 2 * TC * 4)                # partial-sum output blocks
        pass2 = (2 * tm * TC * 2                  # y input double-buffer (bf16)
                 + 2 * tm * TC * 4                # f32 output double-buffer
                 + 4 * TC * 4)                    # scale / shift
        return max(pass1, pass2)

    while TM > 8 and est(TM) > vmem_budget:
        TM = _round_up(TM // 2, 8)
    return TM, TC


def conv_stats_kernel(patches_ref, w_ref, y_ref, psum_ref, psumsq_ref):
    """Pass 1: conv matmul (once) + per-tile per-channel sum / sum-of-squares."""
    y = jnp.dot(patches_ref[...], w_ref[...],
                preferred_element_type=jnp.float32)        # (TM, TC) f32 acc
    y_ref[...] = y.astype(y_ref.dtype)                     # bf16 staging store
    psum_ref[...] = jnp.sum(y, axis=0, keepdims=True)[None]
    psumsq_ref[...] = jnp.sum(y * y, axis=0, keepdims=True)[None]


def bn_relu_apply_kernel(y_ref, scale_ref, shift_ref, out_ref):
    """Pass 2: elementwise folded-BN affine + ReLU (f32 math, lane-dense store)."""
    y = y_ref[...].astype(jnp.float32)
    out_ref[...] = jnp.maximum(y * scale_ref[...] + shift_ref[...], 0.0)


def conv_block_forward(x_nchw, weight, bias, gamma, beta,
                       *, stride=1, padding=0, eps=1e-5, tile_m=512):
    """Equivalent of ConvBlock.forward(x) (fresh module, training-mode BN).

    x_nchw : (N, Cin, H, W) float32
    weight : (Cout, Cin, KH, KW)  conv weight (PyTorch OIHW layout)
    bias   : (Cout,)              conv bias (cancelled exactly by train-mode BN)
    gamma  : (Cout,)              BN weight
    beta   : (Cout,)              BN bias
    """
    del bias  # per-channel constant before BN is removed by mean subtraction.

    N, Cin, H, W = x_nchw.shape
    Cout, _, KH, KW = weight.shape
    s, p = stride, padding
    OH = (H + 2 * p - KH) // s + 1
    OW = (W + 2 * p - KW) // s + 1
    M = N * OH * OW
    K = KH * KW * Cin

    K_pad = _round_up(K, LANE)
    C_pad = _round_up(Cout, LANE)
    vmem_budget = _vmem_budget_bytes()
    TM, TC = _select_tiles(M, K_pad, C_pad, tile_m, vmem_budget)
    M_pad = _round_up(M, TM)
    n_m = M_pad // TM
    n_c = C_pad // TC

    # --- glue: NCHW -> NHWC, cast to bf16 BEFORE im2col, spatial pad ---------
    x = jnp.transpose(x_nchw, (0, 2, 3, 1)).astype(jnp.bfloat16)
    x = jnp.pad(x, ((0, 0), (p, p), (p, p), (0, 0)))
    patches = jnp.stack(
        [x[:, kh:kh + s * OH:s, kw:kw + s * OW:s, :]
         for kh in range(KH) for kw in range(KW)],
        axis=3).reshape(M, K)                               # (M, K) bf16
    patches = jnp.pad(patches, ((0, M_pad - M), (0, K_pad - K)))

    # weight OIHW -> (KH, KW, Cin, Cout) -> (K, Cout): matches patch tap order.
    w = jnp.transpose(weight, (2, 3, 1, 0)).reshape(K, Cout).astype(jnp.bfloat16)
    w = jnp.pad(w, ((0, K_pad - K), (0, C_pad - Cout)))

    gamma_p = jnp.pad(gamma.astype(jnp.float32), (0, C_pad - Cout)).reshape(1, C_pad)
    beta_p = jnp.pad(beta.astype(jnp.float32), (0, C_pad - Cout)).reshape(1, C_pad)

    cp = pltpu.CompilerParams(dimension_semantics=("parallel", "parallel"),
                              vmem_limit_bytes=vmem_budget)

    # ---- pass 1: conv matmul once + per-tile partial BN sums ---------------
    y2d, psum, psumsq = pl.pallas_call(
        conv_stats_kernel,
        out_shape=(jax.ShapeDtypeStruct((M_pad, C_pad), jnp.bfloat16),
                   jax.ShapeDtypeStruct((n_m, 1, C_pad), jnp.float32),
                   jax.ShapeDtypeStruct((n_m, 1, C_pad), jnp.float32)),
        grid=(n_m, n_c),
        in_specs=[pl.BlockSpec((TM, K_pad), lambda m, c: (m, 0)),
                  pl.BlockSpec((K_pad, TC), lambda m, c: (0, c))],
        out_specs=[pl.BlockSpec((TM, TC), lambda m, c: (m, c)),
                   pl.BlockSpec((1, 1, TC), lambda m, c: (m, 0, c)),
                   pl.BlockSpec((1, 1, TC), lambda m, c: (m, 0, c))],
        compiler_params=cp,
    )(patches, w)

    # BatchNorm2d training stats: mean and *biased* variance over N,H,W.
    # Per-tile partials reduced here in f32 (safer than one global accumulator).
    inv_m = 1.0 / float(M)
    ch_sum = jnp.sum(psum, axis=0)                 # (1, C_pad) f32
    ch_sumsq = jnp.sum(psumsq, axis=0)             # (1, C_pad) f32
    mean = ch_sum * inv_m
    var = jnp.maximum(ch_sumsq * inv_m - mean * mean, 0.0)
    inv_std = jax.lax.rsqrt(var + eps)
    scale = gamma_p * inv_std                      # (1, C_pad) f32
    shift = beta_p - mean * scale                  # (1, C_pad) f32

    # ---- pass 2: elementwise scale/shift + ReLU (no second matmul) ---------
    # Module semantics return f32; switch to bf16 if the consumer accepts it.
    out2d = pl.pallas_call(
        bn_relu_apply_kernel,
        out_shape=jax.ShapeDtypeStruct((M_pad, C_pad), jnp.float32),
        grid=(n_m, n_c),
        in_specs=[pl.BlockSpec((TM, TC), lambda m, c: (m, c)),
                  pl.BlockSpec((1, TC), lambda m, c: (0, c)),
                  pl.BlockSpec((1, TC), lambda m, c: (0, c))],
        out_specs=pl.BlockSpec((TM, TC), lambda m, c: (m, c)),
        compiler_params=cp,
    )(y2d, scale, shift)

    # --- glue: crop padding, back to NCHW (module returns channels-first) ---
    out = out2d[:M, :Cout].reshape(N, OH, OW, Cout)
    return jnp.transpose(out, (0, 3, 1, 2))


def _reference(x, weight, bias, gamma, beta, *, stride, padding, eps):
    """Pure-JAX reference (lax conv + BN(train) + ReLU), NCHW, f32 end-to-end."""
    y = jax.lax.conv_general_dilated(
        x, weight, window_strides=(stride, stride),
        padding=((padding, padding), (padding, padding)),
        dimension_numbers=("NCHW", "OIHW", "NCHW"))
    y = y + bias[None, :, None, None]
    mean = y.mean(axis=(0, 2, 3), keepdims=True)
    var = ((y - mean) ** 2).mean(axis=(0, 2, 3), keepdims=True)
    y_hat = (y - mean) / jnp.sqrt(var + eps)
    return jnp.maximum(gamma[None, :, None, None] * y_hat
                       + beta[None, :, None, None], 0.0)


if __name__ == "__main__":
    # ConvBlock(in_c=4, out_c=8, k=3, s=1, p=1) at small shapes.
    N, Cin, H, W = 2, 4, 16, 16
    Cout, KH, KW = 8, 3, 3
    stride, padding, eps = 1, 1, 1e-5

    key = jax.random.PRNGKey(0)
    kx, kw, kb, kg, kbt = jax.random.split(key, 5)

    x = jax.random.normal(kx, (N, Cin, H, W), dtype=jnp.float32)
    # Deterministic synthetic params (shapes from nn.Conv2d / nn.BatchNorm2d).
    weight = 0.1 * jax.random.normal(kw, (Cout, Cin, KH, KW), dtype=jnp.float32)
    bias = 0.1 * jax.random.normal(kb, (Cout,), dtype=jnp.float32)
    gamma = 1.0 + 0.1 * jax.random.normal(kg, (Cout,), dtype=jnp.float32)
    beta = 0.1 * jax.random.normal(kbt, (Cout,), dtype=jnp.float32)

    out = conv_block_forward(x, weight, bias, gamma, beta,
                             stride=stride, padding=padding, eps=eps)
    out = jax.block_until_ready(out)

    ref = _reference(x, weight, bias, gamma, beta,
                     stride=stride, padding=padding, eps=eps)
    assert out.shape == (N, Cout, H, W), out.shape
    # bf16 matmul operands + bf16 y staging (f32 accumulation / BN math)
    # => bf16-level tolerance vs the f32 reference.
    max_err = float(jnp.max(jnp.abs(out - ref)))
    assert jnp.allclose(out, ref, atol=3e-2, rtol=3e-2), max_err

    print("KERNEL_OK")
</pallas_src>

<mosaic_0001>
module attributes {stable_mosaic.version = 11 : i64} {
  func.func @conv_stats_kernel(%arg0: i32, %arg1: i32, %arg2: memref<512x128xbf16, #tpu.memory_space<vmem>>, %arg3: memref<128x128xbf16, #tpu.memory_space<vmem>>, %arg4: memref<512x128xbf16, #tpu.memory_space<vmem>>, %arg5: memref<1x1x128xf32, #tpu.memory_space<vmem>>, %arg6: memref<1x1x128xf32, #tpu.memory_space<vmem>>) attributes {dimension_semantics = [#tpu.dimension_semantics<parallel>, #tpu.dimension_semantics<parallel>], iteration_bounds = array<i64: 1, 1>, scalar_prefetch = 0 : i64, scratch_operands = 0 : i64, tpu.core_type = #tpu.core_type<tc>, window_params = [{transform_indices = @transform_0, window_bounds = array<i64: 512, 128>}, {transform_indices = @transform_1, window_bounds = array<i64: 128, 128>}, {transform_indices = @transform_2, window_bounds = array<i64: 512, 128>}, {transform_indices = @transform_3, window_bounds = array<i64: 1, 1, 128>}, {transform_indices = @transform_4, window_bounds = array<i64: 1, 1, 128>}]} {
    %c0 = arith.constant 0 : index
    %c0_0 = arith.constant 0 : index
    %0 = vector.load %arg2[%c0, %c0_0] : memref<512x128xbf16, #tpu.memory_space<vmem>>, vector<512x128xbf16>
    %c0_1 = arith.constant 0 : index
    %c0_2 = arith.constant 0 : index
    %1 = vector.load %arg3[%c0_1, %c0_2] : memref<128x128xbf16, #tpu.memory_space<vmem>>, vector<128x128xbf16>
    %cst = arith.constant dense<0.000000e+00> : vector<512x128xf32>
    %2 = tpu.matmul %0, %1, %cst {dimension_numbers = #tpu.dot_dimension_numbers<[1], [0], [0], [1], [0, 0, 1, 1], [], []>} : vector<512x128xbf16>, vector<128x128xbf16>, vector<512x128xf32> -> vector<512x128xf32>
    %3 = arith.truncf %2 : vector<512x128xf32> to vector<512x128xbf16>
    %c0_3 = arith.constant 0 : index
    %c0_4 = arith.constant 0 : index
    %4 = vector.load %arg4[%c0_3, %c0_4] : memref<512x128xbf16, #tpu.memory_space<vmem>>, vector<512x128xbf16>
    tpu.vector_store %arg4[%c0_3, %c0_4], %3 {strides = array<i32>} : memref<512x128xbf16, #tpu.memory_space<vmem>>, vector<512x128xbf16>,
    %cst_5 = arith.constant dense<0.000000e+00> : vector<128xf32>
    %5 = vector.multi_reduction <add>, %2, %cst_5 [0] : vector<512x128xf32> to vector<128xf32>
    %6 = vector.shape_cast %5 : vector<128xf32> to vector<1x128xf32>
    %7 = vector.shape_cast %6 : vector<1x128xf32> to vector<1x1x128xf32>
    %c0_6 = arith.constant 0 : index
    %c0_7 = arith.constant 0 : index
    %c0_8 = arith.constant 0 : index
    %8 = vector.load %arg5[%c0_6, %c0_7, %c0_8] : memref<1x1x128xf32, #tpu.memory_space<vmem>>, vector<1x1x128xf32>
    tpu.vector_store %arg5[%c0_6, %c0_7, %c0_8], %7 {strides = array<i32>} : memref<1x1x128xf32, #tpu.memory_space<vmem>>, vector<1x1x128xf32>,
    %9 = arith.mulf %2, %2 : vector<512x128xf32>
    %cst_9 = arith.constant dense<0.000000e+00> : vector<128xf32>
    %10 = vector.multi_reduction <add>, %9, %cst_9 [0] : vector<512x128xf32> to vector<128xf32>
    %11 = vector.shape_cast %10 : vector<128xf32> to vector<1x128xf32>
    %12 = vector.shape_cast %11 : vector<1x128xf32> to vector<1x1x128xf32>
    %c0_10 = arith.constant 0 : index
    %c0_11 = arith.constant 0 : index
    %c0_12 = arith.constant 0 : index
    %13 = vector.load %arg6[%c0_10, %c0_11, %c0_12] : memref<1x1x128xf32, #tpu.memory_space<vmem>>, vector<1x1x128xf32>
    tpu.vector_store %arg6[%c0_10, %c0_11, %c0_12], %12 {strides = array<i32>} : memref<1x1x128xf32, #tpu.memory_space<vmem>>, vector<1x1x128xf32>,
    return
  }
  func.func @transform_0(%arg0: i32, %arg1: i32) -> (i32, i32) {
    %c0_i32 = arith.constant 0 : i32
    %c0_i32_0 = arith.constant 0 : i32
    return %arg0, %c0_i32 : i32, i32
  }
  func.func @transform_1(%arg0: i32, %arg1: i32) -> (i32, i32) {
    %c0_i32 = arith.constant 0 : i32
    %c0_i32_0 = arith.constant 0 : i32
    return %c0_i32, %arg1 : i32, i32
  }
  func.func @transform_2(%arg0: i32, %arg1: i32) -> (i32, i32) {
    %c0_i32 = arith.constant 0 : i32
    return %arg0, %arg1 : i32, i32
  }
  func.func @transform_3(%arg0: i32, %arg1: i32) -> (i32, i32, i32) {
    %c0_i32 = arith.constant 0 : i32
    %c0_i32_0 = arith.constant 0 : i32
    return %arg0, %c0_i32, %arg1 : i32, i32, i32
  }
  func.func @transform_4(%arg0: i32, %arg1: i32) -> (i32, i32, i32) {
    %c0_i32 = arith.constant 0 : i32
    %c0_i32_0 = arith.constant 0 : i32
    return %arg0, %c0_i32, %arg1 : i32, i32, i32
  }
}

</mosaic_0001>

<bundles_post_ra>
// kernel: tpu_custom_call.1
= control target key start
LH: loop header
LB: loop body
LE: loop exit
PB: predicated region body
PF: predicated region fallthrough
CT: control target
= control target key end

     0   :  { %10 = vsyncpa [#allocation3], 0  ;;  %s2184_s0 = inlined_call_operand.hbm [shape: bf16[512,128], index: 0, kind: input, shape index: {}]   ;;  %s2185_s1 = inlined_call_operand.hbm [shape: bf16[128,128], index: 1, kind: input, shape index: {}]   ;;  %s2186_s2 = inlined_call_operand.hbm [shape: bf16[512,128], index: 2, kind: output, shape index: {0}]   ;;  %s2187_s3 = inlined_call_operand.hbm [shape: f32[1,1,128], index: 3, kind: output, shape index: {1}]   ;;  %s2188_s4 = inlined_call_operand.hbm [shape: f32[1,1,128], index: 4, kind: output, shape index: {2}]  }
   0x1   :  { %11 = vsyncpa [#allocation6], 0 }
   0x2   :  { %12 = vsyncpa [#allocation4], 0 }
   0x3   :  { %13 = vsyncpa [#allocation9], 0  ;;  %s1883_s15 = smov [#allocation2]   ;;  %s1765_s19 = scalar_lea.hbm %s2184_s0, 4096 }
   0x4   :  { %s19_s16 = sshll.u32 %s1883_s15, 4  ;;  %p1766_p0 = scmp.ne.s32.totalorder %s2184_s0, %s1765_s19  ;;  %s20_s16 = int_to_ptr.vmem [resolvable:$true] %s19_s16 }
   0x5   :  { %p1769_p1 = scmp.lt.u32.totalorder %s1765_s19, %s2184_s0 }
   0x7   :  { %p1771_p2 = pnand %p1769_p1, %p1766_p0 }
   0x9   :  { %1774 = shalt.err (!%p1771_p2)
}
   0xa   :  { %s1775_s24 = scalar_lea.vmem %s20_s16, 4096  ;;  %p1780_p4 = scmp.lt.s32.totalorder %s20_s16, %s20_s16 }
   0xb   :  { %p1776_p3 = scmp.ne.s32.totalorder %s20_s16, %s1775_s24  ;;  %p1781_p5 = scmp.lt.s32.totalorder %s1775_s24, %s1775_s24 }
   0xd   :  { %p1782_p6 = por %p1781_p5, %p1780_p4 }
   0xf   :  { %p1783_p7 = pnand %p1782_p6, %p1776_p3 }
  0x11   :  { %1786 = shalt.err (!%p1783_p7)
}
  0x12   :  { %s1884_s25 = smov 64   ;;  %s1885_s26 = smov 4  }
  0x13   :  { %25 = dma.hbm_to_vmem [thread:$0]  %s2184_s0, 4096, %s20_s16, [#allocation3], %s1884_s25, %s1884_s25, %s1885_s26  }
  0x14   :  { %s1886_s29 = smov [#allocation5]   ;;  %s1787_s7 = scalar_lea.hbm %s2185_s1, 1024 }
  0x15   :  { %s31_s30 = sshll.u32 %s1886_s29, 4  ;;  %p1788_p8 = scmp.ne.s32.totalorder %s2185_s1, %s1787_s7  ;;  %s32_s30 = int_to_ptr.vmem [resolvable:$true] %s31_s30 }
  0x16   :  { %p1791_p9 = scmp.lt.u32.totalorder %s1787_s7, %s2185_s1 }
  0x18   :  { %p1793_p10 = pnand %p1791_p9, %p1788_p8 }
  0x1a   :  { %1796 = shalt.err (!%p1793_p10)
}
  0x1b   :  { %s1797_s12 = scalar_lea.vmem %s32_s30, 1024  ;;  %p1802_p12 = scmp.lt.s32.totalorder %s32_s30, %s32_s30 }
  0x1c   :  { %p1798_p11 = scmp.ne.s32.totalorder %s32_s30, %s1797_s12  ;;  %p1803_p13 = scmp.lt.s32.totalorder %s1797_s12, %s1797_s12 }
  0x1e   :  { %p1804_p0 = por %p1803_p13, %p1802_p12 }
  0x20   :  { %p1805_p1 = pnand %p1804_p0, %p1798_p11 }
  0x22   :  { %1808 = shalt.err (!%p1805_p1)
}
  0x23   :  { %37 = dma.hbm_to_vmem [thread:$0]  %s2185_s1, 1024, %s32_s30, [#allocation6], %s1884_s25, %s1884_s25, %s1885_s26  }
  0x24   :  { %1875 = dma.done.wait [#allocation3], 4096  }
  0x25   :  { %1876 = vsyncadd [#allocation3], 4294963200 }
  0x26   :  { %1877 = dma.done.wait [#allocation6], 1024  }
  0x27   :  { %1878 = vsyncadd [#allocation6], 4294966272  ;;  %v1725_v0 = vld [vmem:[#allocation5] sm:$0xff]   ;;  %v1726_v1 = vld [vmem:[#allocation5 + $0x8] sm:$0xff]   ;;  %s1887_s1 = smov [#allocation7]  }
  0x28   :  { %1622 = vmatprep.subr.bf16.mxu0 %v1725_v0  ;;  %1702 = vmatprep.subr.bf16.mxu1 %v1725_v0  ;;  %v1727_v2 = vld [vmem:[#allocation5 + $0x10] sm:$0xff]   ;;  %v1728_v3 = vld [vmem:[#allocation5 + $0x18] sm:$0xff]   ;;  %v1733_v4 = vld [vmem:[#allocation2] sm:$0xff]   ;;  %s1183_s14 = sshll.u32 %s1887_s1, 4  ;;  %s1184_s14 = int_to_ptr.vmem [resolvable:$true] %s1183_s14 }
  0x29   :  { %1623 = vmatpush3.bf16.msra.mxu0 %v1725_v0  ;;  %1710 = vmatpush3.bf16.msra.mxu1 %v1725_v0  ;;  %v1729_v5 = vld [vmem:[#allocation5 + $0x20] sm:$0xff]   ;;  %v1730_v6 = vld [vmem:[#allocation5 + $0x28] sm:$0xff]   ;;  %v1731_v7 = vld [vmem:[#allocation5 + $0x30] sm:$0xff]   ;;  %s1809_s15 = scalar_lea.vmem %s1184_s14, 4096  ;;  %p1814_p3 = scmp.lt.s32.totalorder %s1184_s14, %s1184_s14 }
  0x2a   :  { %1624 = vmatprep.subr.bf16.mxu0 %v1726_v1  ;;  %1703 = vmatprep.subr.bf16.mxu1 %v1726_v1  ;;  %v1732_v8 = vld [vmem:[#allocation5 + $0x38] sm:$0xff]   ;;  %v1749_v9 = vld [vmem:[#allocation2 + $0x80] sm:$0xff]   ;;  %v1734_v10 = vld [vmem:[#allocation2 + $0x8] sm:$0xff]   ;;  %p1810_p2 = scmp.ne.s32.totalorder %s1184_s14, %s1809_s15  ;;  %p1815_p4 = scmp.lt.s32.totalorder %s1809_s15, %s1809_s15 }
  0x2b   :  { %1638 = vmatprep.mubr.bf16.mxu0 %v1733_v4  ;;  %1670 = vmatprep.mubr.bf16.mxu1 %v1749_v9  ;;  %v1735_v11 = vld [vmem:[#allocation2 + $0x10] sm:$0xff]   ;;  %v1750_v12 = vld [vmem:[#allocation2 + $0x88] sm:$0xff]   ;;  %v1736_v14 = vld [vmem:[#allocation2 + $0x18] sm:$0xff]  }
  0x2c   :  { %v1751_v13 = vld [vmem:[#allocation2 + $0x90] sm:$0xff]   ;;  %v1737_v15 = vld [vmem:[#allocation2 + $0x20] sm:$0xff]   ;;  %v1752_v16 = vld [vmem:[#allocation2 + $0x98] sm:$0xff]   ;;  %p1816_p5 = por %p1815_p4, %p1814_p3 }
  0x2d   :  { %1625 = vmatpush3.bf16.msra.mxu0 %v1726_v1  ;;  %1711 = vmatpush3.bf16.msra.mxu1 %v1726_v1  ;;  %v1753_v17 = vld [vmem:[#allocation2 + $0xa0] sm:$0xff]   ;;  %v1738_v18 = vld [vmem:[#allocation2 + $0x28] sm:$0xff]   ;;  %v1739_v20 = vld [vmem:[#allocation2 + $0x30] sm:$0xff]  }
  0x2e   :  { %1626 = vmatprep.subr.bf16.mxu0 %v1727_v2  ;;  %1704 = vmatprep.subr.bf16.mxu1 %v1727_v2  ;;  %v1754_v19 = vld [vmem:[#allocation2 + $0xa8] sm:$0xff]   ;;  %v1755_v21 = vld [vmem:[#allocation2 + $0xb0] sm:$0xff]   ;;  %v1740_v22 = vld [vmem:[#allocation2 + $0x38] sm:$0xff]   ;;  %p1817_p6 = pnand %p1816_p5, %p1810_p2 }
  0x2f   :  { %v1756_v23 = vld [vmem:[#allocation2 + $0xb8] sm:$0xff]   ;;  %v1741_v24 = vld [vmem:[#allocation2 + $0x40] sm:$0xff]   ;;  %v1742_v26 = vld [vmem:[#allocation2 + $0x48] sm:$0xff]  }
  0x30   :  { %v1757_v25 = vld [vmem:[#allocation2 + $0xc0] sm:$0xff]   ;;  %v1758_v27 = vld [vmem:[#allocation2 + $0xc8] sm:$0xff]   ;;  %v1743_v28 = vld [vmem:[#allocation2 + $0x50] sm:$0xff]  }
  0x31   :  { %1627 = vmatpush3.bf16.msra.mxu0 %v1727_v2  ;;  %1712 = vmatpush3.bf16.msra.mxu1 %v1727_v2  ;;  %v1759_v29 = vld [vmem:[#allocation2 + $0xd0] sm:$0xff]   ;;  %v1744_v30 = vld [vmem:[#allocation2 + $0x58] sm:$0xff]   ;;  %v1745_v32 = vld [vmem:[#allocation2 + $0x60] sm:$0xff]  }
  0x32   :  { %1628 = vmatprep.subr.bf16.mxu0 %v1728_v3  ;;  %1705 = vmatprep.subr.bf16.mxu1 %v1728_v3  ;;  %v1760_v31 = vld [vmem:[#allocation2 + $0xd8] sm:$0xff]   ;;  %v1761_v33 = vld [vmem:[#allocation2 + $0xe0] sm:$0xff]   ;;  %v1746_v34 = vld [vmem:[#allocation2 + $0x68] sm:$0xff]  }
  0x33   :  { %v1762_v35 = vld [vmem:[#allocation2 + $0xe8] sm:$0xff]   ;;  %v1747_v36 = vld [vmem:[#allocation2 + $0x70] sm:$0xff]   ;;  %v1748_v38 = vld [vmem:[#allocation2 + $0x78] sm:$0xff]  }
  0x34   :  { %v1763_v37 = vld [vmem:[#allocation2 + $0xf0] sm:$0xff]   ;;  %v1764_v39 = vld [vmem:[#allocation2 + $0xf8] sm:$0xff]  }
  0x35   :  { %1629 = vmatpush3.bf16.msra.mxu0 %v1728_v3  ;;  %1713 = vmatpush3.bf16.msra.mxu1 %v1728_v3 }
  0x36   :  { %1630 = vmatprep.subr.bf16.mxu0 %v1729_v5  ;;  %1706 = vmatprep.subr.bf16.mxu1 %v1729_v5 }
  0x39   :  { %1631 = vmatpush3.bf16.msra.mxu0 %v1729_v5  ;;  %1714 = vmatpush3.bf16.msra.mxu1 %v1729_v5 }
  0x3a   :  { %1632 = vmatprep.subr.bf16.mxu0 %v1730_v6  ;;  %1707 = vmatprep.subr.bf16.mxu1 %v1730_v6 }
  0x3d   :  { %1633 = vmatpush3.bf16.msra.mxu0 %v1730_v6  ;;  %1715 = vmatpush3.bf16.msra.mxu1 %v1730_v6 }
  0x3e   :  { %1634 = vmatprep.subr.bf16.mxu0 %v1731_v7  ;;  %1708 = vmatprep.subr.bf16.mxu1 %v1731_v7 }
  0x41   :  { %1635 = vmatpush3.bf16.msra.mxu0 %v1731_v7  ;;  %1716 = vmatpush3.bf16.msra.mxu1 %v1731_v7 }
  0x42   :  { %1636 = vmatprep.subr.bf16.mxu0 %v1732_v8  ;;  %1709 = vmatprep.subr.bf16.mxu1 %v1732_v8 }
  0x45   :  { %1637 = vmatpush3.bf16.msra.mxu0 %v1732_v8  ;;  %1717 = vmatpush3.bf16.msra.mxu1 %v1732_v8 }
  0x48   :  { %1639 = vmatmul.mubr.bf16.vlgmr.msra.gmra.mrb[0].mxu0 %v1734_v10  ;;  %1671 = vmatmul.mubr.bf16.vlgmr.msra.gmra.mrb[0].mxu1 %v1750_v12 }
  0x49   :  { %1642 = vmatprep.mubr.bf16.mxu0 %v1735_v11  ;;  %1674 = vmatprep.mubr.bf16.mxu1 %v1751_v13 }
  0x50   :  { %1643 = vmatmul.mubr.bf16.gmra.mrb[4].mxu0 %v1736_v14  ;;  %1675 = vmatmul.mubr.bf16.gmra.mrb[4].mxu1 %v1752_v16 }
  0x51   :  { %1646 = vmatprep.mubr.bf16.mxu0 %v1737_v15  ;;  %1678 = vmatprep.mubr.bf16.mxu1 %v1753_v17 }
  0x58   :  { %1647 = vmatmul.mubr.bf16.gmra.mrb[8].mxu0 %v1738_v18  ;;  %1679 = vmatmul.mubr.bf16.gmra.mrb[8].mxu1 %v1754_v19 }
  0x59   :  { %1650 = vmatprep.mubr.bf16.mxu0 %v1739_v20  ;;  %1682 = vmatprep.mubr.bf16.mxu1 %v1755_v21 }
  0x60   :  { %1651 = vmatmul.mubr.bf16.gmra.mrb[12].mxu0 %v1740_v22  ;;  %1683 = vmatmul.mubr.bf16.gmra.mrb[12].mxu1 %v1756_v23 }
  0x61   :  { %1654 = vmatprep.mubr.bf16.mxu0 %v1741_v24  ;;  %1686 = vmatprep.mubr.bf16.mxu1 %v1757_v25 }
  0x68   :  { %1655 = vmatmul.mubr.bf16.gmra.mrb[16].mxu0 %v1742_v26  ;;  %1687 = vmatmul.mubr.bf16.gmra.mrb[16].mxu1 %v1758_v27 }
  0x69   :  { %1658 = vmatprep.mubr.bf16.mxu0 %v1743_v28  ;;  %1690 = vmatprep.mubr.bf16.mxu1 %v1759_v29 }
  0x70   :  { %1659 = vmatmul.mubr.bf16.gmra.mrb[20].mxu0 %v1744_v30  ;;  %1691 = vmatmul.mubr.bf16.gmra.mrb[20].mxu1 %v1760_v31 }
  0x71   :  { %1662 = vmatprep.mubr.bf16.mxu0 %v1745_v32  ;;  %1694 = vmatprep.mubr.bf16.mxu1 %v1761_v33 }
  0x78   :  { %1663 = vmatmul.mubr.bf16.gmra.mrb[24].mxu0 %v1746_v34  ;;  %1695 = vmatmul.mubr.bf16.gmra.mrb[24].mxu1 %v1762_v35 }
  0x79   :  { %1666 = vmatprep.mubr.bf16.mxu0 %v1747_v36  ;;  %1698 = vmatprep.mubr.bf16.mxu1 %v1763_v37 }
  0x80   :  { %1667 = vmatmul.mubr.bf16.gmra.mrb[28].mxu0 %v1748_v38  ;;  %1699 = vmatmul.mubr.bf16.gmra.mrb[28].mxu1 %v1764_v39 }
 0x11b   :  { %v1640_v40 = vpop.f32.mrb[0].mxu0  ;;  %v1945_v41 = vpop.f32.mrb[0].mxu1 }
 0x11c   :  { %v399_v42 = vpop.f32.mrb[1].mxu0  ;;  %v1947_v43 = vpop.f32.mrb[1].mxu1  ;;  %v1046_v55 = vmul.f32 %v1640_v40, %v1640_v40 }
 0x11d   :  { %v1641_v44 = vpop.f32.mrb[2].mxu0  ;;  %v1949_v45 = vpop.f32.mrb[2].mxu1  ;;  %v1044_v46 = vmul.f32 %v399_v42, %v399_v42 }
 0x11e   :  { %v1399_v47 = vpack.c.bf16 %v1641_v44, %v1640_v40  ;;  %v402_v48 = vpop.f32.mrb[3].mxu0  ;;  %v1479_v49 = vpack.c.bf16 %v1949_v45, %v1945_v41  ;;  %v1953_v50 = vpop.f32.mrb[3].mxu1  ;;  %v1047_v58 = vmul.f32 %v1641_v44, %v1641_v44 }
 0x11f   :  { %v1394_v51 = vpack.c.bf16 %v402_v48, %v399_v42  ;;  %v974_v52 = vadd.f32 %v402_v48, %v399_v42  ;;  %v1045_v53 = vmul.f32 %v402_v48, %v402_v48  ;;  %v1474_v54 = vpack.c.bf16 %v1953_v50, %v1947_v43 }
 0x120   :  { %1551 = vst [vmem:[#allocation7 + $0x8] sm:$0xff] %v1399_v47   ;;  %1567 = vst [vmem:[#allocation7 + $0x88] sm:$0xff] %v1479_v49  }
 0x121   :  { %1395 = vst [vmem:[#allocation7] sm:$0xff] %v1394_v51   ;;  %v975_v56 = vadd.f32 %v1640_v40, %v974_v52  ;;  %v1108_v57 = vadd.f32 %v1045_v53, %v1044_v46  ;;  %1566 = vst [vmem:[#allocation7 + $0x80] sm:$0xff] %v1474_v54  }
 0x123   :  { %v1109_v59 = vadd.f32 %v1108_v57, %v1046_v55  ;;  %v1644_v60 = vpop.f32.mrb[4].mxu0  ;;  %v976_v61 = vadd.f32 %v1641_v44, %v975_v56  ;;  %v1957_v62 = vpop.f32.mrb[4].mxu1 }
 0x124   :  { %v415_v63 = vpop.f32.mrb[5].mxu0  ;;  %v1959_v0 = vpop.f32.mrb[5].mxu1  ;;  %v1050_v15 = vmul.f32 %v1644_v60, %v1644_v60 }
 0x125   :  { %v977_v1 = vadd.f32 %v976_v61, %v415_v63  ;;  %v1048_v2 = vmul.f32 %v415_v63, %v415_v63  ;;  %v1110_v3 = vadd.f32 %v1109_v59, %v1047_v58  ;;  %v1645_v4 = vpop.f32.mrb[6].mxu0  ;;  %v1961_v5 = vpop.f32.mrb[6].mxu1 }
 0x126   :  { %v1409_v6 = vpack.c.bf16 %v1645_v4, %v1644_v60  ;;  %v418_v7 = vpop.f32.mrb[7].mxu0  ;;  %v1489_v8 = vpack.c.bf16 %v1961_v5, %v1957_v62  ;;  %v1965_v9 = vpop.f32.mrb[7].mxu1  ;;  %v1051_v18 = vmul.f32 %v1645_v4, %v1645_v4 }
 0x127   :  { %v1111_v10 = vadd.f32 %v1110_v3, %v1048_v2  ;;  %v1404_v11 = vpack.c.bf16 %v418_v7, %v415_v63  ;;  %v978_v12 = vadd.f32 %v977_v1, %v418_v7  ;;  %v1049_v13 = vmul.f32 %v418_v7, %v418_v7 }
 0x128   :  { %1553 = vst [vmem:[#allocation7 + $0x18] sm:$0xff] %v1409_v6   ;;  %1569 = vst [vmem:[#allocation7 + $0x98] sm:$0xff] %v1489_v8   ;;  %v1484_v14 = vpack.c.bf16 %v1965_v9, %v1959_v0 }
 0x129   :  { %1552 = vst [vmem:[#allocation7 + $0x10] sm:$0xff] %v1404_v11   ;;  %v979_v16 = vadd.f32 %v1644_v60, %v978_v12  ;;  %v1112_v17 = vadd.f32 %v1111_v10, %v1049_v13 }
 0x12a   :  { %1568 = vst [vmem:[#allocation7 + $0x90] sm:$0xff] %v1484_v14  }
 0x12b   :  { %v1113_v19 = vadd.f32 %v1112_v17, %v1050_v15  ;;  %v1648_v20 = vpop.f32.mrb[8].mxu0  ;;  %v980_v21 = vadd.f32 %v1645_v4, %v979_v16  ;;  %v1969_v22 = vpop.f32.mrb[8].mxu1 }
 0x12c   :  { %v431_v23 = vpop.f32.mrb[9].mxu0  ;;  %v1971_v24 = vpop.f32.mrb[9].mxu1  ;;  %v1054_v39 = vmul.f32 %v1648_v20, %v1648_v20 }
 0x12d   :  { %v981_v25 = vadd.f32 %v980_v21, %v431_v23  ;;  %v1052_v26 = vmul.f32 %v431_v23, %v431_v23  ;;  %v1114_v27 = vadd.f32 %v1113_v19, %v1051_v18  ;;  %v1649_v28 = vpop.f32.mrb[10].mxu0  ;;  %v1973_v29 = vpop.f32.mrb[10].mxu1 }
 0x12e   :  { %v1419_v30 = vpack.c.bf16 %v1649_v28, %v1648_v20  ;;  %v434_v31 = vpop.f32.mrb[11].mxu0  ;;  %v1499_v32 = vpack.c.bf16 %v1973_v29, %v1969_v22  ;;  %v1977_v33 = vpop.f32.mrb[11].mxu1  ;;  %v1055_v44 = vmul.f32 %v1649_v28, %v1649_v28 }
 0x12f   :  { %v1115_v34 = vadd.f32 %v1114_v27, %v1052_v26  ;;  %v1414_v35 = vpack.c.bf16 %v434_v31, %v431_v23  ;;  %v982_v36 = vadd.f32 %v981_v25, %v434_v31  ;;  %v1053_v37 = vmul.f32 %v434_v31, %v434_v31 }
 0x130   :  { %1555 = vst [vmem:[#allocation7 + $0x28] sm:$0xff] %v1419_v30   ;;  %1571 = vst [vmem:[#allocation7 + $0xa8] sm:$0xff] %v1499_v32   ;;  %v1494_v38 = vpack.c.bf16 %v1977_v33, %v1971_v24 }
 0x131   :  { %1554 = vst [vmem:[#allocation7 + $0x20] sm:$0xff] %v1414_v35   ;;  %v983_v40 = vadd.f32 %v1648_v20, %v982_v36  ;;  %v1116_v42 = vadd.f32 %v1115_v34, %v1053_v37 }
 0x132   :  { %1570 = vst [vmem:[#allocation7 + $0xa0] sm:$0xff] %v1494_v38  }
 0x133   :  { %v1117_v46 = vadd.f32 %v1116_v42, %v1054_v39  ;;  %v1652_v47 = vpop.f32.mrb[12].mxu0  ;;  %v984_v48 = vadd.f32 %v1649_v28, %v983_v40  ;;  %v1981_v49 = vpop.f32.mrb[12].mxu1 }
 0x134   :  { %v447_v51 = vpop.f32.mrb[13].mxu0  ;;  %v1983_v52 = vpop.f32.mrb[13].mxu1  ;;  %v1058_v6 = vmul.f32 %v1652_v47, %v1652_v47 }
 0x135   :  { %v985_v53 = vadd.f32 %v984_v48, %v447_v51  ;;  %v1056_v54 = vmul.f32 %v447_v51, %v447_v51  ;;  %v1118_v55 = vadd.f32 %v1117_v46, %v1055_v44  ;;  %v1653_v56 = vpop.f32.mrb[14].mxu0  ;;  %v1985_v57 = vpop.f32.mrb[14].mxu1 }
 0x136   :  { %v1429_v58 = vpack.c.bf16 %v1653_v56, %v1652_v47  ;;  %v450_v59 = vpop.f32.mrb[15].mxu0  ;;  %v1509_v60 = vpack.c.bf16 %v1985_v57, %v1981_v49  ;;  %v1989_v61 = vpop.f32.mrb[15].mxu1  ;;  %v1059_v10 = vmul.f32 %v1653_v56, %v1653_v56 }
 0x137   :  { %v1119_v63 = vadd.f32 %v1118_v55, %v1056_v54  ;;  %v1424_v1 = vpack.c.bf16 %v450_v59, %v447_v51  ;;  %v986_v2 = vadd.f32 %v985_v53, %v450_v59  ;;  %v1057_v3 = vmul.f32 %v450_v59, %v450_v59 }
 0x138   :  { %1557 = vst [vmem:[#allocation7 + $0x38] sm:$0xff] %v1429_v58   ;;  %1573 = vst [vmem:[#allocation7 + $0xb8] sm:$0xff] %v1509_v60   ;;  %v1504_v4 = vpack.c.bf16 %v1989_v61, %v1983_v52 }
 0x139   :  { %1556 = vst [vmem:[#allocation7 + $0x30] sm:$0xff] %v1424_v1   ;;  %v987_v7 = vadd.f32 %v1652_v47, %v986_v2  ;;  %v1120_v8 = vadd.f32 %v1119_v63, %v1057_v3 }
 0x13a   :  { %1572 = vst [vmem:[#allocation7 + $0xb0] sm:$0xff] %v1504_v4  }
 0x13b   :  { %v1121_v11 = vadd.f32 %v1120_v8, %v1058_v6  ;;  %v1656_v12 = vpop.f32.mrb[16].mxu0  ;;  %v988_v13 = vadd.f32 %v1653_v56, %v987_v7  ;;  %v1993_v14 = vpop.f32.mrb[16].mxu1 }
 0x13c   :  { %v463_v15 = vpop.f32.mrb[17].mxu0  ;;  %v1995_v16 = vpop.f32.mrb[17].mxu1  ;;  %v1062_v35 = vmul.f32 %v1656_v12, %v1656_v12 }
 0x13d   :  { %v989_v17 = vadd.f32 %v988_v13, %v463_v15  ;;  %v1060_v18 = vmul.f32 %v463_v15, %v463_v15  ;;  %v1122_v19 = vadd.f32 %v1121_v11, %v1059_v10  ;;  %v1657_v20 = vpop.f32.mrb[18].mxu0  ;;  %v1997_v21 = vpop.f32.mrb[18].mxu1 }
 0x13e   :  { %v1439_v23 = vpack.c.bf16 %v1657_v20, %v1656_v12  ;;  %v466_v25 = vpop.f32.mrb[19].mxu0  ;;  %v1519_v26 = vpack.c.bf16 %v1997_v21, %v1993_v14  ;;  %v2001_v27 = vpop.f32.mrb[19].mxu1  ;;  %v1063_v38 = vmul.f32 %v1657_v20, %v1657_v20 }
 0x13f   :  { %v1123_v28 = vadd.f32 %v1122_v19, %v1060_v18  ;;  %v1434_v30 = vpack.c.bf16 %v466_v25, %v463_v15  ;;  %v990_v31 = vadd.f32 %v989_v17, %v466_v25  ;;  %v1061_v32 = vmul.f32 %v466_v25, %v466_v25 }
 0x140   :  { %1559 = vst [vmem:[#allocation7 + $0x48] sm:$0xff] %v1439_v23   ;;  %1575 = vst [vmem:[#allocation7 + $0xc8] sm:$0xff] %v1519_v26   ;;  %v1514_v34 = vpack.c.bf16 %v2001_v27, %v1995_v16 }
 0x141   :  { %1558 = vst [vmem:[#allocation7 + $0x40] sm:$0xff] %v1434_v30   ;;  %v991_v36 = vadd.f32 %v1656_v12, %v990_v31  ;;  %v1124_v37 = vadd.f32 %v1123_v28, %v1061_v32 }
 0x142   :  { %1574 = vst [vmem:[#allocation7 + $0xc0] sm:$0xff] %v1514_v34  }
 0x143   :  { %v1125_v39 = vadd.f32 %v1124_v37, %v1062_v35  ;;  %v1660_v40 = vpop.f32.mrb[20].mxu0  ;;  %v992_v42 = vadd.f32 %v1657_v20, %v991_v36  ;;  %v2005_v44 = vpop.f32.mrb[20].mxu1 }
 0x144   :  { %v479_v46 = vpop.f32.mrb[21].mxu0  ;;  %v2007_v47 = vpop.f32.mrb[21].mxu1  ;;  %v1066_v6 = vmul.f32 %v1660_v40, %v1660_v40 }
 0x145   :  { %v993_v48 = vadd.f32 %v992_v42, %v479_v46  ;;  %v1064_v51 = vmul.f32 %v479_v46, %v479_v46  ;;  %v1126_v53 = vadd.f32 %v1125_v39, %v1063_v38  ;;  %v1661_v54 = vpop.f32.mrb[22].mxu0  ;;  %v2009_v55 = vpop.f32.mrb[22].mxu1 }
 0x146   :  { %v1449_v56 = vpack.c.bf16 %v1661_v54, %v1660_v40  ;;  %v482_v58 = vpop.f32.mrb[23].mxu0  ;;  %v1529_v59 = vpack.c.bf16 %v2009_v55, %v2005_v44  ;;  %v2013_v60 = vpop.f32.mrb[23].mxu1  ;;  %v1067_v10 = vmul.f32 %v1661_v54, %v1661_v54 }
 0x147   :  { %v1127_v63 = vadd.f32 %v1126_v53, %v1064_v51  ;;  %v1444_v1 = vpack.c.bf16 %v482_v58, %v479_v46  ;;  %v994_v2 = vadd.f32 %v993_v48, %v482_v58  ;;  %v1065_v3 = vmul.f32 %v482_v58, %v482_v58 }
 0x148   :  { %1561 = vst [vmem:[#allocation7 + $0x58] sm:$0xff] %v1449_v56   ;;  %1577 = vst [vmem:[#allocation7 + $0xd8] sm:$0xff] %v1529_v59   ;;  %v1524_v4 = vpack.c.bf16 %v2013_v60, %v2007_v47 }
 0x149   :  { %1560 = vst [vmem:[#allocation7 + $0x50] sm:$0xff] %v1444_v1   ;;  %v995_v7 = vadd.f32 %v1660_v40, %v994_v2  ;;  %v1128_v8 = vadd.f32 %v1127_v63, %v1065_v3 }
 0x14a   :  { %1576 = vst [vmem:[#allocation7 + $0xd0] sm:$0xff] %v1524_v4  }
 0x14b   :  { %v1129_v11 = vadd.f32 %v1128_v8, %v1066_v6  ;;  %v1664_v12 = vpop.f32.mrb[24].mxu0  ;;  %v996_v13 = vadd.f32 %v1661_v54, %v995_v7  ;;  %v2017_v15 = vpop.f32.mrb[24].mxu1 }
 0x14c   :  { %v495_v17 = vpop.f32.mrb[25].mxu0  ;;  %v2019_v18 = vpop.f32.mrb[25].mxu1  ;;  %v1070_v39 = vmul.f32 %v1664_v12, %v1664_v12 }
 0x14d   :  { %v997_v19 = vadd.f32 %v996_v13, %v495_v17  ;;  %v1068_v20 = vmul.f32 %v495_v17, %v495_v17  ;;  %v1130_v23 = vadd.f32 %v1129_v11, %v1067_v10  ;;  %v1665_v25 = vpop.f32.mrb[26].mxu0  ;;  %v2021_v26 = vpop.f32.mrb[26].mxu1 }
 0x14e   :  { %v1459_v28 = vpack.c.bf16 %v1665_v25, %v1664_v12  ;;  %v498_v30 = vpop.f32.mrb[27].mxu0  ;;  %v1539_v31 = vpack.c.bf16 %v2021_v26, %v2017_v15  ;;  %v2025_v32 = vpop.f32.mrb[27].mxu1  ;;  %v1071_v46 = vmul.f32 %v1665_v25, %v1665_v25 }
 0x14f   :  { %v1131_v34 = vadd.f32 %v1130_v23, %v1068_v20  ;;  %v1454_v35 = vpack.c.bf16 %v498_v30, %v495_v17  ;;  %v998_v36 = vadd.f32 %v997_v19, %v498_v30  ;;  %v1069_v37 = vmul.f32 %v498_v30, %v498_v30 }
 0x150   :  { %1563 = vst [vmem:[#allocation7 + $0x68] sm:$0xff] %v1459_v28   ;;  %1579 = vst [vmem:[#allocation7 + $0xe8] sm:$0xff] %v1539_v31   ;;  %v1534_v38 = vpack.c.bf16 %v2025_v32, %v2019_v18  ;;  %v1076_v31 = vmul.f32 %v1947_v43, %v1947_v43 }
 0x151   :  { %1562 = vst [vmem:[#allocation7 + $0x60] sm:$0xff] %v1454_v35   ;;  %v999_v40 = vadd.f32 %v1664_v12, %v998_v36  ;;  %v1132_v42 = vadd.f32 %v1131_v34, %v1069_v37 }
 0x152   :  { %1578 = vst [vmem:[#allocation7 + $0xe0] sm:$0xff] %v1534_v38  }
 0x153   :  { %v1133_v48 = vadd.f32 %v1132_v42, %v1070_v39  ;;  %v1668_v51 = vpop.f32.mrb[28].mxu0  ;;  %v1000_v53 = vadd.f32 %v1665_v25, %v999_v40  ;;  %v2029_v54 = vpop.f32.mrb[28].mxu1 }
 0x154   :  { %v511_v56 = vpop.f32.mrb[29].mxu0  ;;  %v2031_v58 = vpop.f32.mrb[29].mxu1  ;;  %v1074_v19 = vmul.f32 %v1668_v51, %v1668_v51 }
 0x155   :  { %v1001_v59 = vadd.f32 %v1000_v53, %v511_v56  ;;  %v1072_v63 = vmul.f32 %v511_v56, %v511_v56  ;;  %v1134_v1 = vadd.f32 %v1133_v48, %v1071_v46  ;;  %v1669_v2 = vpop.f32.mrb[30].mxu0  ;;  %v2033_v3 = vpop.f32.mrb[30].mxu1 }
 0x156   :  { %v1469_v4 = vpack.c.bf16 %v1669_v2, %v1668_v51  ;;  %v514_v6 = vpop.f32.mrb[31].mxu0  ;;  %v1549_v7 = vpack.c.bf16 %v2033_v3, %v2029_v54  ;;  %v2037_v8 = vpop.f32.mrb[31].mxu1  ;;  %v1075_v25 = vmul.f32 %v1669_v2, %v1669_v2 }
 0x157   :  { %v1135_v10 = vadd.f32 %v1134_v1, %v1072_v63  ;;  %v1464_v11 = vpack.c.bf16 %v514_v6, %v511_v56  ;;  %v1002_v12 = vadd.f32 %v1001_v59, %v514_v6  ;;  %v1073_v13 = vmul.f32 %v514_v6, %v514_v6 }
 0x158   :  { %1565 = vst [vmem:[#allocation7 + $0x78] sm:$0xff] %v1469_v4   ;;  %1581 = vst [vmem:[#allocation7 + $0xf8] sm:$0xff] %v1549_v7   ;;  %v1544_v17 = vpack.c.bf16 %v2037_v8, %v2031_v58 }
 0x159   :  { %1564 = vst [vmem:[#allocation7 + $0x70] sm:$0xff] %v1464_v11   ;;  %v1003_v20 = vadd.f32 %v1668_v51, %v1002_v12  ;;  %v1136_v23 = vadd.f32 %v1135_v10, %v1073_v13 }
 0x15a   :  { %1580 = vst [vmem:[#allocation7 + $0xf0] sm:$0xff] %v1544_v17  }
 0x15b   :  { %v1137_v28 = vadd.f32 %v1136_v23, %v1074_v19  ;;  %v1004_v30 = vadd.f32 %v1669_v2, %v1003_v20 }
 0x15c   :  { %1820 = shalt.err (!%p1817_p6)
}
 0x15d   :  { %s1821_s18 = scalar_lea.hbm %s2186_s2, 4096 }
 0x15e   :  { %p1822_p7 = scmp.ne.s32.totalorder %s2186_s2, %s1821_s18  ;;  %p1825_p8 = scmp.lt.u32.totalorder %s1821_s18, %s2186_s2 }
 0x160   :  { %p1827_p9 = pnand %p1825_p8, %p1822_p7 }
 0x162   :  { %1830 = shalt.err (!%p1827_p9)
}
 0x163   :  { %1189 = dma.vmem_to_hbm [thread:$0]  %s1184_s14, 4096, %s2186_s2, [#allocation4], %s1884_s25, %s1884_s25, %s1885_s26   ;;  %v1005_v34 = vadd.f32 %v1004_v30, %v1947_v43  ;;  %v1138_v35 = vadd.f32 %v1137_v28, %v1075_v25  ;;  %v1077_v38 = vmul.f32 %v1953_v50, %v1953_v50  ;;  %v1078_v39 = vmul.f32 %v1945_v41, %v1945_v41 }
 0x164   :  { %v1079_v46 = vmul.f32 %v1949_v45, %v1949_v45  ;;  %v1080_v43 = vmul.f32 %v1959_v0, %v1959_v0  ;;  %v1081_v63 = vmul.f32 %v1965_v9, %v1965_v9  ;;  %v1085_v12 = vmul.f32 %v1977_v33, %v1977_v33  ;;  %s1888_s2 = smov [#allocation8]   ;;  %s1889_s26 = smov [#allocation10]  }
 0x165   :  { %v1139_v36 = vadd.f32 %v1138_v35, %v1076_v31  ;;  %v1006_v37 = vadd.f32 %v1005_v34, %v1953_v50  ;;  %v1089_v30 = vmul.f32 %v1989_v61, %v1989_v61  ;;  %s1196_s25 = sshll.u32 %s1888_s2, 4  ;;  %s1206_s27 = sshll.u32 %s1889_s26, 4  ;;  %s1197_s25 = int_to_ptr.vmem [resolvable:$true] %s1196_s25  ;;  %s2152_s27 = int_to_ptr.vmem [resolvable:$true] %s1206_s27 }
 0x166   :  { %s1831_s28 = scalar_lea.vmem %s1197_s25, 16  ;;  %s1835_s29 = scalar_lea.vmem %s1197_s25, 32 }
 0x167   :  { %v1007_v40 = vadd.f32 %v1945_v41, %v1006_v37  ;;  %v1140_v42 = vadd.f32 %v1139_v36, %v1077_v38  ;;  %v1082_v41 = vmul.f32 %v1957_v62, %v1957_v62  ;;  %p1832_p10 = scmp.ne.s32.totalorder %s1197_s25, %s1831_s28  ;;  %p1836_p11 = scmp.lt.s32.totalorder %s1197_s25, %s1197_s25 }
 0x168   :  { %p1837_p12 = scmp.lt.s32.totalorder %s1835_s29, %s1831_s28 }
 0x169   :  { %v1141_v48 = vadd.f32 %v1140_v42, %v1078_v39  ;;  %v1008_v51 = vadd.f32 %v1949_v45, %v1007_v40  ;;  %v1083_v45 = vmul.f32 %v1961_v5, %v1961_v5  ;;  %v1093_v40 = vmul.f32 %v2001_v27, %v2001_v27 }
 0x16a   :  { %p1838_p13 = por %p1837_p12, %p1836_p11 }
 0x16b   :  { %v1009_v53 = vadd.f32 %v1008_v51, %v1959_v0  ;;  %v1142_v56 = vadd.f32 %v1141_v48, %v1079_v46  ;;  %v1084_v0 = vmul.f32 %v1971_v24, %v1971_v24 }
 0x16c   :  { %p1839_p0 = pnand %p1838_p13, %p1832_p10 }
 0x16d   :  { %v1143_v59 = vadd.f32 %v1142_v56, %v1080_v43  ;;  %v1010_v50 = vadd.f32 %v1009_v53, %v1965_v9 }
 0x16f   :  { %v1011_v1 = vadd.f32 %v1957_v62, %v1010_v50  ;;  %v1144_v2 = vadd.f32 %v1143_v59, %v1081_v63  ;;  %v1086_v62 = vmul.f32 %v1969_v22, %v1969_v22  ;;  %v1097_v59 = vmul.f32 %v2013_v60, %v2013_v60 }
 0x171   :  { %v1145_v4 = vadd.f32 %v1144_v2, %v1082_v41  ;;  %v1012_v6 = vadd.f32 %v1961_v5, %v1011_v1  ;;  %v1087_v5 = vmul.f32 %v1973_v29, %v1973_v29 }
 0x173   :  { %v1013_v7 = vadd.f32 %v1012_v6, %v1971_v24  ;;  %v1146_v10 = vadd.f32 %v1145_v4, %v1083_v45  ;;  %v1088_v24 = vmul.f32 %v1983_v52, %v1983_v52  ;;  %v1101_v6 = vmul.f32 %v2025_v32, %v2025_v32 }
 0x175   :  { %v1147_v11 = vadd.f32 %v1146_v10, %v1084_v0  ;;  %v1014_v9 = vadd.f32 %v1013_v7, %v1977_v33 }
 0x177   :  { %v1015_v13 = vadd.f32 %v1969_v22, %v1014_v9  ;;  %v1148_v17 = vadd.f32 %v1147_v11, %v1085_v12  ;;  %v1090_v22 = vmul.f32 %v1981_v49, %v1981_v49 }
 0x179   :  { %v1149_v19 = vadd.f32 %v1148_v17, %v1086_v62  ;;  %v1016_v20 = vadd.f32 %v1973_v29, %v1015_v13  ;;  %v1091_v29 = vmul.f32 %v1985_v57, %v1985_v57  ;;  %v1105_v13 = vmul.f32 %v2037_v8, %v2037_v8 }
 0x17b   :  { %v1017_v23 = vadd.f32 %v1016_v20, %v1983_v52  ;;  %v1150_v25 = vadd.f32 %v1149_v19, %v1087_v5  ;;  %v1092_v52 = vmul.f32 %v1995_v16, %v1995_v16 }
 0x17d   :  { %v1151_v28 = vadd.f32 %v1150_v25, %v1088_v24  ;;  %v1018_v33 = vadd.f32 %v1017_v23, %v1989_v61 }
 0x17f   :  { %v1019_v31 = vadd.f32 %v1981_v49, %v1018_v33  ;;  %v1152_v34 = vadd.f32 %v1151_v28, %v1089_v30  ;;  %v1094_v49 = vmul.f32 %v1993_v14, %v1993_v14 }
 0x181   :  { %v1153_v35 = vadd.f32 %v1152_v34, %v1090_v22  ;;  %v1020_v36 = vadd.f32 %v1985_v57, %v1019_v31  ;;  %v1095_v57 = vmul.f32 %v1997_v21, %v1997_v21 }
 0x183   :  { %v1021_v37 = vadd.f32 %v1020_v36, %v1995_v16  ;;  %v1154_v38 = vadd.f32 %v1153_v35, %v1091_v29  ;;  %v1096_v16 = vmul.f32 %v2007_v47, %v2007_v47 }
 0x185   :  { %v1155_v39 = vadd.f32 %v1154_v38, %v1092_v52  ;;  %v1022_v61 = vadd.f32 %v1021_v37, %v2001_v27 }
 0x187   :  { %v1023_v42 = vadd.f32 %v1993_v14, %v1022_v61  ;;  %v1156_v46 = vadd.f32 %v1155_v39, %v1093_v40  ;;  %v1098_v14 = vmul.f32 %v2005_v44, %v2005_v44 }
 0x189   :  { %v1157_v48 = vadd.f32 %v1156_v46, %v1094_v49  ;;  %v1024_v51 = vadd.f32 %v1997_v21, %v1023_v42  ;;  %v1099_v21 = vmul.f32 %v2009_v55, %v2009_v55 }
 0x18b   :  { %v1025_v43 = vadd.f32 %v1024_v51, %v2007_v47  ;;  %v1158_v53 = vadd.f32 %v1157_v48, %v1095_v57  ;;  %v1100_v47 = vmul.f32 %v2019_v18, %v2019_v18 }
 0x18d   :  { %v1159_v56 = vadd.f32 %v1158_v53, %v1096_v16  ;;  %v1026_v27 = vadd.f32 %v1025_v43, %v2013_v60 }
 0x18f   :  { %v1027_v50 = vadd.f32 %v2005_v44, %v1026_v27  ;;  %v1160_v63 = vadd.f32 %v1159_v56, %v1097_v59  ;;  %v1102_v44 = vmul.f32 %v2017_v15, %v2017_v15 }
 0x191   :  { %v1161_v41 = vadd.f32 %v1160_v63, %v1098_v14  ;;  %v1028_v1 = vadd.f32 %v2009_v55, %v1027_v50  ;;  %v1103_v55 = vmul.f32 %v2021_v26, %v2021_v26 }
 0x193   :  { %v1029_v2 = vadd.f32 %v1028_v1, %v2019_v18  ;;  %v1162_v45 = vadd.f32 %v1161_v41, %v1099_v21  ;;  %v1104_v18 = vmul.f32 %v2031_v58, %v2031_v58 }
 0x195   :  { %v1163_v4 = vadd.f32 %v1162_v45, %v1100_v47  ;;  %v1030_v60 = vadd.f32 %v1029_v2, %v2025_v32 }
 0x197   :  { %v1031_v0 = vadd.f32 %v2017_v15, %v1030_v60  ;;  %v1164_v7 = vadd.f32 %v1163_v4, %v1101_v6  ;;  %v1106_v15 = vmul.f32 %v2029_v54, %v2029_v54 }
 0x199   :  { %v1165_v10 = vadd.f32 %v1164_v7, %v1102_v44  ;;  %v1032_v11 = vadd.f32 %v2021_v26, %v1031_v0  ;;  %v1107_v26 = vmul.f32 %v2033_v3, %v2033_v3 }
 0x19b   :  { %v1033_v9 = vadd.f32 %v1032_v11, %v2031_v58  ;;  %v1166_v12 = vadd.f32 %v1165_v10, %v1103_v55 }
 0x19d   :  { %v1167_v62 = vadd.f32 %v1166_v12, %v1104_v18  ;;  %v1034_v32 = vadd.f32 %v1033_v9, %v2037_v8 }
 0x19f   :  { %v1035_v17 = vadd.f32 %v2029_v54, %v1034_v32  ;;  %v1168_v5 = vadd.f32 %v1167_v62, %v1105_v13 }
 0x1a1   :  { %v1036_v19 = vadd.f32 %v2033_v3, %v1035_v17  ;;  %v1169_v20 = vadd.f32 %v1168_v5, %v1106_v15 }
 0x1a3   :  { %v1037_v58 = vrot.slane %v1036_v19, 4  ;;  %v1170_v24 = vadd.f32 %v1169_v20, %v1107_v26 }
 0x1a5   :  { %v1171_v23 = vrot.slane %v1170_v24, 4  ;;  %v1038_v25 = vadd.f32 %v1037_v58, %v1036_v19 }
 0x1a7   :  { %v1039_v28 = vrot.slane %v1038_v25, 2  ;;  %v1172_v33 = vadd.f32 %v1171_v23, %v1170_v24 }
 0x1a9   :  { %v1040_v30 = vadd.f32 %v1039_v28, %v1038_v25  ;;  %v1173_v8 = vrot.slane %v1172_v33, 2 }
 0x1ab   :  { %v1041_v22 = vrot.slane %v1040_v30, 1  ;;  %v1174_v31 = vadd.f32 %v1173_v8, %v1172_v33 }
 0x1ad   :  { %v1042_v54 = vadd.f32 %v1041_v22, %v1040_v30  ;;  %v1175_v34 = vrot.slane %v1174_v31, 1 }
 0x1af   :  { %1043 = vst [vmem:[#allocation8] sm:$0x1] %v1042_v54  ;;  %v1176_v3 = vadd.f32 %v1175_v34, %v1174_v31 }
 0x1b0   :  { %1842 = shalt.err (!%p1839_p0)
}
 0x1b1   :  { %s1843_s6 = scalar_lea.hbm %s2187_s3, 16 }
 0x1b2   :  { %p1844_p1 = scmp.ne.s32.totalorder %s2187_s3, %s1843_s6  ;;  %p1847_p2 = scmp.lt.u32.totalorder %s1843_s6, %s2187_s3 }
 0x1b4   :  { %p1849_p3 = pnand %p1847_p2, %p1844_p1 }
 0x1b6   :  { %1852 = shalt.err (!%p1849_p3)
}
 0x1b7   :  { %1199 = dma.vmem_to_hbm [thread:$0]  %s1197_s25, 16, %s2187_s3, [#allocation9]   ;;  %1177 = vst [vmem:[#allocation10] sm:$0x1] %v1176_v3 }
 0x1b8   :  { %s1853_s0 = scalar_lea.vmem %s2152_s27, 16  ;;  %s1857_s13 = scalar_lea.vmem %s2152_s27, 32 }
 0x1b9   :  { %p1854_p4 = scmp.ne.s32.totalorder %s2152_s27, %s1853_s0  ;;  %p1858_p5 = scmp.lt.s32.totalorder %s2152_s27, %s2152_s27 }
 0x1ba   :  { %p1859_p6 = scmp.lt.s32.totalorder %s1857_s13, %s1853_s0 }
 0x1bc   :  { %p1860_p7 = por %p1859_p6, %p1858_p5 }
 0x1be   :  { %p1861_p8 = pnand %p1860_p7, %p1854_p4 }
 0x1c0   :  { %1864 = shalt.err (!%p1861_p8)
}
 0x1c1   :  { %s1865_s15 = scalar_lea.hbm %s2188_s4, 16 }
 0x1c2   :  { %p1866_p9 = scmp.ne.s32.totalorder %s2188_s4, %s1865_s15  ;;  %p1869_p10 = scmp.lt.u32.totalorder %s1865_s15, %s2188_s4 }
 0x1c4   :  { %p1871_p11 = pnand %p1869_p10, %p1866_p9 }
 0x1c6   :  { %1874 = shalt.err (!%p1871_p11)
}
 0x1c7   :  { %1209 = dma.vmem_to_hbm [thread:$0]  %s2152_s27, 16, %s2188_s4, [#allocation9]  }
 0x1c8   :  { %1879 = dma.done.wait [#allocation4], 4096  }
 0x1c9   :  { %1880 = vsyncadd [#allocation4], 4294963200 }
 0x1ca   :  { %1881 = dma.done.wait [#allocation9], 32  }
 0x1cb   :  { %1882 = vsyncadd [#allocation9], 4294967264 }
 0x1cc   :  { %1219 = vsyncpa [#allocation3], 1 }
 0x1cd   :  { %1220 = vsyncpa [#allocation6], 1 }
 0x1ce   :  { %1221 = vsyncpa [#allocation4], 1 }
 0x1cf   :  { %1222 = vsyncpa [#allocation9], 1 }

</bundles_post_ra>
